<compile_context>
chip_gen: v7x
topology: tpu7x:2x2x1
jax: 0.10.0
libtpu: 0.0.40
codegen_flags: <defaults>
</compile_context>

<pallas_src>
import functools

import jax
import jax.numpy as jnp
from jax.experimental import pallas as pl
from jax.experimental.pallas import tpu as pltpu

D = 128          # padded feature width (hidden 120 and output 16 pad to 128)
N_LAYERS = 5
BIAS_ROWS = 8    # 5 bias rows padded up to a clean (8, 128) f32 tile


def _round_up(x, m):
    return (x + m - 1) // m * m


def mlp_kernel(x_ref, w_ref, b_ref, o_ref):
    """x_ref: (bm, in_dim) f32, w_ref: (5, 128, 128) bf16,
    b_ref: (8, 128) f32, o_ref: (bm, 128) f32."""
    in_dim = x_ref.shape[-1]                 # static (block shape)
    b_all = b_ref[...]                       # (8, 128) f32 biases
    h = x_ref[...].astype(jnp.bfloat16)      # cast to bf16 in-kernel

    # fc1: only the first in_dim rows of the zero-padded weight matter;
    # static slice (in_dim = 32 is a multiple of the bf16 sublane pack).
    w0 = w_ref[0][:in_dim, :]
    acc = jnp.dot(h, w0, preferred_element_type=jnp.float32)
    acc = jnp.maximum(acc + b_all[0:1, :], 0.0)
    h = acc.astype(jnp.bfloat16)

    # fc2..fc4: bf16 matmul with f32 accumulation, bias + ReLU in f32.
    for i in range(1, N_LAYERS - 1):
        acc = jnp.dot(h, w_ref[i], preferred_element_type=jnp.float32)
        acc = jnp.maximum(acc + b_all[i:i + 1, :], 0.0)
        h = acc.astype(jnp.bfloat16)

    # fc5: no activation; full lane-dense 128-wide f32 store.
    acc = jnp.dot(h, w_ref[N_LAYERS - 1], preferred_element_type=jnp.float32)
    o_ref[...] = (acc + b_all[N_LAYERS - 1:N_LAYERS, :]).astype(o_ref.dtype)


def pack_params(params):
    """params: list of (W, b) with W (in, out) f32, b (out,) f32.
    Returns (w_blob bf16 (5,128,128), b_blob f32 (8,128))."""
    assert len(params) == N_LAYERS
    w_blob = jnp.zeros((N_LAYERS, D, D), jnp.float32)
    b_blob = jnp.zeros((BIAS_ROWS, D), jnp.float32)
    for i, (w, b) in enumerate(params):
        fi, fo = w.shape
        assert fi <= D and fo <= D, "this packed kernel assumes all dims <= 128"
        w_blob = w_blob.at[i, :fi, :fo].set(w)
        b_blob = b_blob.at[i, :fo].set(jnp.reshape(b, (-1,)))
    return w_blob.astype(jnp.bfloat16), b_blob


def _choose_bm(batch):
    """Batch tile size.

    * batch <= 128: one block, rounded up to 16 rows (bf16 sublane pack).
    * batch  > 128: big tiles (per-grid-step overhead dominates tiny tiles),
      capped at 2048 rows and chosen so the grid has >= 2 steps so both v7x
      TensorCores get work under dimension_semantics=("parallel",).
    """
    if batch <= 128:
        return max(16, _round_up(batch, 16))
    bm = _round_up(pl.cdiv(batch, 2), 128)
    return max(128, min(2048, bm))


def _forward_padded_impl(x, w_blob, b_blob):
    """x: (batch, in_dim) f32 -> (rows, 128) f32 padded output slab.
    Valid data lives in [:batch, :out_dim]; remaining lanes/rows are padding."""
    batch, in_dim = x.shape
    assert in_dim <= D

    bm = _choose_bm(batch)
    if batch <= 128:
        rows = bm
        if rows != batch:
            # Tiny (<16 rows) explicit zero pad; single full block, grid = 1.
            x = jnp.pad(x, ((0, rows - batch), (0, 0)))
    else:
        # Ragged grid: last block's out-of-bounds rows read unspecified data
        # and their outputs are discarded on writeback. Rows are independent
        # through every layer, so this is safe -- keep that invariant.
        rows = batch
    grid = (pl.cdiv(rows, bm),)

    cost = pl.CostEstimate(
        flops=2 * rows * (in_dim * D + (N_LAYERS - 1) * D * D),
        transcendentals=0,
        bytes_accessed=rows * in_dim * 4 + rows * D * 4
                       + w_blob.size * 2 + b_blob.size * 4,
    )

    return pl.pallas_call(
        mlp_kernel,
        out_shape=jax.ShapeDtypeStruct((rows, D), jnp.float32),
        grid=grid,
        in_specs=[
            pl.BlockSpec((bm, in_dim), lambda i: (i, 0)),              # x: streams
            pl.BlockSpec((N_LAYERS, D, D), lambda i: (0, 0, 0)),       # weights: resident
            pl.BlockSpec((BIAS_ROWS, D), lambda i: (0, 0)),            # biases: resident
        ],
        out_specs=pl.BlockSpec((bm, D), lambda i: (i, 0)),
        compiler_params=pltpu.CompilerParams(
            dimension_semantics=("parallel",),
        ),
        cost_estimate=cost,
    )(x, w_blob, b_blob)


# Preferred entry point when embedding in a larger graph: returns the padded
# (rows, 128) slab so the consumer can slice lazily (avoids an extra HBM pass).
net_forward_padded = jax.jit(_forward_padded_impl)


@functools.partial(jax.jit, static_argnames=("out_dim",))
def net_forward(x, w_blob, b_blob, *, out_dim):
    """Convenience wrapper returning exactly (batch, out_dim) f32."""
    batch = x.shape[0]
    return _forward_padded_impl(x, w_blob, b_blob)[:batch, :out_dim]


def init_params(key, input_dim, output_dim, hidden_dim=120):
    """Matches torch.nn.Linear's U(-1/sqrt(fan_in), 1/sqrt(fan_in)) init,
    stored as (in, out) so each layer is y = x @ W + b."""
    dims = [(input_dim, hidden_dim),
            (hidden_dim, hidden_dim),
            (hidden_dim, hidden_dim),
            (hidden_dim, hidden_dim),
            (hidden_dim, output_dim)]
    params = []
    for fan_in, fan_out in dims:
        key, kw, kb = jax.random.split(key, 3)
        bound = 1.0 / jnp.sqrt(jnp.float32(fan_in))
        w = jax.random.uniform(kw, (fan_in, fan_out), jnp.float32, -bound, bound)
        b = jax.random.uniform(kb, (fan_out,), jnp.float32, -bound, bound)
        params.append((w, b))
    return params


def reference_forward_f32(x, params):
    """Pure-f32 reference with the original (unpacked, unquantized) params."""
    h = x
    for i, (w, b) in enumerate(params):
        h = h @ w + b[None, :]
        if i < len(params) - 1:
            h = jnp.maximum(h, 0.0)
    return h


def reference_forward_bf16(x, w_blob, b_blob, out_dim):
    """Reference that mirrors the kernel's numerics (bf16 operands, f32 acc)."""
    in_dim = x.shape[1]
    h = x.astype(jnp.bfloat16)
    acc = jnp.dot(h, w_blob[0][:in_dim, :], preferred_element_type=jnp.float32)
    acc = jnp.maximum(acc + b_blob[0:1, :], 0.0)
    h = acc.astype(jnp.bfloat16)
    for i in range(1, N_LAYERS - 1):
        acc = jnp.dot(h, w_blob[i], preferred_element_type=jnp.float32)
        acc = jnp.maximum(acc + b_blob[i:i + 1, :], 0.0)
        h = acc.astype(jnp.bfloat16)
    acc = jnp.dot(h, w_blob[N_LAYERS - 1], preferred_element_type=jnp.float32)
    acc = acc + b_blob[N_LAYERS - 1:N_LAYERS, :]
    return acc[:, :out_dim]


if __name__ == "__main__":
    key = jax.random.PRNGKey(0)
    key, kx, kx2 = jax.random.split(key, 3)

    batch, input_dim, output_dim, hidden_dim = 8, 32, 16, 120
    x = jax.random.normal(kx, (batch, input_dim), jnp.float32)
    params = init_params(key, input_dim, output_dim, hidden_dim)
    w_blob, b_blob = pack_params(params)

    # --- Small-batch path (single block, grid = 1) ---
    out = net_forward(x, w_blob, b_blob, out_dim=output_dim)
    out = jax.block_until_ready(out)
    assert out.shape == (batch, output_dim)

    ref_bf16 = reference_forward_bf16(x, w_blob, b_blob, output_dim)
    assert jnp.allclose(out, ref_bf16, atol=2e-2, rtol=2e-2)

    ref_f32 = reference_forward_f32(x, params)
    assert jnp.allclose(out, ref_f32, atol=1e-1, rtol=1e-1)

    # --- Larger-batch path (multi-step ragged grid, parallel batch axis) ---
    batch2 = 300
    x2 = jax.random.normal(kx2, (batch2, input_dim), jnp.float32)
    out2 = net_forward(x2, w_blob, b_blob, out_dim=output_dim)
    out2 = jax.block_until_ready(out2)
    assert out2.shape == (batch2, output_dim)
    ref2 = reference_forward_bf16(x2, w_blob, b_blob, output_dim)
    assert jnp.allclose(out2, ref2, atol=2e-2, rtol=2e-2)

    print("KERNEL_OK")
</pallas_src>

<mosaic_0001>
module attributes {stable_mosaic.version = 11 : i64} {
  func.func @mlp_kernel(%arg0: i32, %arg1: memref<16x32xf32, #tpu.memory_space<vmem>>, %arg2: memref<5x128x128xbf16, #tpu.memory_space<vmem>>, %arg3: memref<8x128xf32, #tpu.memory_space<vmem>>, %arg4: memref<16x128xf32, #tpu.memory_space<vmem>>) attributes {dimension_semantics = [#tpu.dimension_semantics<parallel>], iteration_bounds = array<i64: 1>, scalar_prefetch = 0 : i64, scratch_operands = 0 : i64, tpu.core_type = #tpu.core_type<tc>, window_params = [{transform_indices = @transform_0, window_bounds = array<i64: 16, 32>}, {pipeline_mode = #tpu.pipeline_mode<synchronous>, transform_indices = @transform_1, window_bounds = array<i64: 5, 128, 128>}, {pipeline_mode = #tpu.pipeline_mode<synchronous>, transform_indices = @transform_2, window_bounds = array<i64: 8, 128>}, {transform_indices = @transform_3, window_bounds = array<i64: 16, 128>}]} {
    %c0 = arith.constant 0 : index
    %c0_0 = arith.constant 0 : index
    %0 = vector.load %arg3[%c0, %c0_0] : memref<8x128xf32, #tpu.memory_space<vmem>>, vector<8x128xf32>
    %c0_1 = arith.constant 0 : index
    %c0_2 = arith.constant 0 : index
    %1 = vector.load %arg1[%c0_1, %c0_2] : memref<16x32xf32, #tpu.memory_space<vmem>>, vector<16x32xf32>
    %2 = arith.truncf %1 : vector<16x32xf32> to vector<16x32xbf16>
    %c0_3 = arith.constant 0 : index
    %c0_4 = arith.constant 0 : index
    %c0_5 = arith.constant 0 : index
    %3 = vector.load %arg2[%c0_3, %c0_4, %c0_5] : memref<5x128x128xbf16, #tpu.memory_space<vmem>>, vector<1x128x128xbf16>
    %4 = vector.shape_cast %3 : vector<1x128x128xbf16> to vector<128x128xbf16>
    %5 = vector.extract_strided_slice %4 {offsets = [0, 0], sizes = [32, 128], strides = [1, 1]} : vector<128x128xbf16> to vector<32x128xbf16>
    %cst = arith.constant dense<0.000000e+00> : vector<16x128xf32>
    %6 = tpu.matmul %2, %5, %cst {dimension_numbers = #tpu.dot_dimension_numbers<[1], [0], [0], [1], [0, 0, 1, 1], [], []>} : vector<16x32xbf16>, vector<32x128xbf16>, vector<16x128xf32> -> vector<16x128xf32>
    %7 = vector.extract_strided_slice %0 {offsets = [0, 0], sizes = [1, 128], strides = [1, 1]} : vector<8x128xf32> to vector<1x128xf32>
    %8 = vector.broadcast %7 : vector<1x128xf32> to vector<16x128xf32>
    %9 = arith.addf %6, %8 : vector<16x128xf32>
    %cst_6 = arith.constant 0.000000e+00 : f32
    %10 = vector.broadcast %cst_6 : f32 to vector<16x128xf32>
    %11 = arith.maximumf %9, %10 : vector<16x128xf32>
    %12 = arith.truncf %11 : vector<16x128xf32> to vector<16x128xbf16>
    %c1 = arith.constant 1 : index
    %c0_7 = arith.constant 0 : index
    %c0_8 = arith.constant 0 : index
    %13 = vector.load %arg2[%c1, %c0_7, %c0_8] : memref<5x128x128xbf16, #tpu.memory_space<vmem>>, vector<1x128x128xbf16>
    %14 = vector.shape_cast %13 : vector<1x128x128xbf16> to vector<128x128xbf16>
    %cst_9 = arith.constant dense<0.000000e+00> : vector<16x128xf32>
    %15 = tpu.matmul %12, %14, %cst_9 {dimension_numbers = #tpu.dot_dimension_numbers<[1], [0], [0], [1], [0, 0, 1, 1], [], []>} : vector<16x128xbf16>, vector<128x128xbf16>, vector<16x128xf32> -> vector<16x128xf32>
    %16 = vector.extract_strided_slice %0 {offsets = [1, 0], sizes = [1, 128], strides = [1, 1]} : vector<8x128xf32> to vector<1x128xf32>
    %17 = vector.broadcast %16 : vector<1x128xf32> to vector<16x128xf32>
    %18 = arith.addf %15, %17 : vector<16x128xf32>
    %cst_10 = arith.constant 0.000000e+00 : f32
    %19 = vector.broadcast %cst_10 : f32 to vector<16x128xf32>
    %20 = arith.maximumf %18, %19 : vector<16x128xf32>
    %21 = arith.truncf %20 : vector<16x128xf32> to vector<16x128xbf16>
    %c2 = arith.constant 2 : index
    %c0_11 = arith.constant 0 : index
    %c0_12 = arith.constant 0 : index
    %22 = vector.load %arg2[%c2, %c0_11, %c0_12] : memref<5x128x128xbf16, #tpu.memory_space<vmem>>, vector<1x128x128xbf16>
    %23 = vector.shape_cast %22 : vector<1x128x128xbf16> to vector<128x128xbf16>
    %cst_13 = arith.constant dense<0.000000e+00> : vector<16x128xf32>
    %24 = tpu.matmul %21, %23, %cst_13 {dimension_numbers = #tpu.dot_dimension_numbers<[1], [0], [0], [1], [0, 0, 1, 1], [], []>} : vector<16x128xbf16>, vector<128x128xbf16>, vector<16x128xf32> -> vector<16x128xf32>
    %25 = vector.extract_strided_slice %0 {offsets = [2, 0], sizes = [1, 128], strides = [1, 1]} : vector<8x128xf32> to vector<1x128xf32>
    %26 = vector.broadcast %25 : vector<1x128xf32> to vector<16x128xf32>
    %27 = arith.addf %24, %26 : vector<16x128xf32>
    %cst_14 = arith.constant 0.000000e+00 : f32
    %28 = vector.broadcast %cst_14 : f32 to vector<16x128xf32>
    %29 = arith.maximumf %27, %28 : vector<16x128xf32>
    %30 = arith.truncf %29 : vector<16x128xf32> to vector<16x128xbf16>
    %c3 = arith.constant 3 : index
    %c0_15 = arith.constant 0 : index
    %c0_16 = arith.constant 0 : index
    %31 = vector.load %arg2[%c3, %c0_15, %c0_16] : memref<5x128x128xbf16, #tpu.memory_space<vmem>>, vector<1x128x128xbf16>
    %32 = vector.shape_cast %31 : vector<1x128x128xbf16> to vector<128x128xbf16>
    %cst_17 = arith.constant dense<0.000000e+00> : vector<16x128xf32>
    %33 = tpu.matmul %30, %32, %cst_17 {dimension_numbers = #tpu.dot_dimension_numbers<[1], [0], [0], [1], [0, 0, 1, 1], [], []>} : vector<16x128xbf16>, vector<128x128xbf16>, vector<16x128xf32> -> vector<16x128xf32>
    %34 = vector.extract_strided_slice %0 {offsets = [3, 0], sizes = [1, 128], strides = [1, 1]} : vector<8x128xf32> to vector<1x128xf32>
    %35 = vector.broadcast %34 : vector<1x128xf32> to vector<16x128xf32>
    %36 = arith.addf %33, %35 : vector<16x128xf32>
    %cst_18 = arith.constant 0.000000e+00 : f32
    %37 = vector.broadcast %cst_18 : f32 to vector<16x128xf32>
    %38 = arith.maximumf %36, %37 : vector<16x128xf32>
    %39 = arith.truncf %38 : vector<16x128xf32> to vector<16x128xbf16>
    %c4 = arith.constant 4 : index
    %c0_19 = arith.constant 0 : index
    %c0_20 = arith.constant 0 : index
    %40 = vector.load %arg2[%c4, %c0_19, %c0_20] : memref<5x128x128xbf16, #tpu.memory_space<vmem>>, vector<1x128x128xbf16>
    %41 = vector.shape_cast %40 : vector<1x128x128xbf16> to vector<128x128xbf16>
    %cst_21 = arith.constant dense<0.000000e+00> : vector<16x128xf32>
    %42 = tpu.matmul %39, %41, %cst_21 {dimension_numbers = #tpu.dot_dimension_numbers<[1], [0], [0], [1], [0, 0, 1, 1], [], []>} : vector<16x128xbf16>, vector<128x128xbf16>, vector<16x128xf32> -> vector<16x128xf32>
    %43 = vector.extract_strided_slice %0 {offsets = [4, 0], sizes = [1, 128], strides = [1, 1]} : vector<8x128xf32> to vector<1x128xf32>
    %44 = vector.broadcast %43 : vector<1x128xf32> to vector<16x128xf32>
    %45 = arith.addf %42, %44 : vector<16x128xf32>
    %c0_22 = arith.constant 0 : index
    %c0_23 = arith.constant 0 : index
    %46 = vector.load %arg4[%c0_22, %c0_23] : memref<16x128xf32, #tpu.memory_space<vmem>>, vector<16x128xf32>
    tpu.vector_store %arg4[%c0_22, %c0_23], %45 {strides = array<i32>} : memref<16x128xf32, #tpu.memory_space<vmem>>, vector<16x128xf32>,
    return
  }
  func.func @transform_0(%arg0: i32) -> (i32, i32) {
    %c0_i32 = arith.constant 0 : i32
    %c0_i32_0 = arith.constant 0 : i32
    return %arg0, %c0_i32 : i32, i32
  }
  func.func @transform_1(%arg0: i32) -> (i32, i32, i32) {
    %c0_i32 = arith.constant 0 : i32
    %c0_i32_0 = arith.constant 0 : i32
    %c0_i32_1 = arith.constant 0 : i32
    %c0_i32_2 = arith.constant 0 : i32
    return %c0_i32, %c0_i32_0, %c0_i32_1 : i32, i32, i32
  }
  func.func @transform_2(%arg0: i32) -> (i32, i32) {
    %c0_i32 = arith.constant 0 : i32
    %c0_i32_0 = arith.constant 0 : i32
    %c0_i32_1 = arith.constant 0 : i32
    return %c0_i32, %c0_i32_0 : i32, i32
  }
  func.func @transform_3(%arg0: i32) -> (i32, i32) {
    %c0_i32 = arith.constant 0 : i32
    %c0_i32_0 = arith.constant 0 : i32
    return %arg0, %c0_i32 : i32, i32
  }
}

</mosaic_0001>

<bundles_post_ra>
// kernel: net_forward.1
= control target key start
LH: loop header
LB: loop body
LE: loop exit
PB: predicated region body
PF: predicated region fallthrough
CT: control target
= control target key end

     0   :  { %8 = vsyncpa [#allocation3], 0  ;;  %s782_s12 = smov [#allocation2]   ;;  %s892_s0 = inlined_call_operand.vmem [shape: f32[16,32], index: 0, kind: input, shape index: {}]   ;;  %s893_s1 = inlined_call_operand.hbm [shape: bf16[5,128,128], index: 1, kind: input, shape index: {}]   ;;  %s894_s2 = inlined_call_operand.vmem [shape: f32[8,128], index: 2, kind: input, shape index: {}]   ;;  %s895_s3 = inlined_call_operand.vmem [shape: f32[16,128], index: 3, kind: output, shape index: {}]  }
   0x1   :  { %s16_s13 = sshll.u32 %s782_s12, 4  ;;  %s758_s16 = scalar_lea.hbm %s893_s1, 5120  ;;  %s17_s13 = int_to_ptr.vmem [resolvable:$true] %s16_s13 }
   0x2   :  { %p759_p0 = scmp.ne.s32.totalorder %s893_s1, %s758_s16  ;;  %p762_p1 = scmp.lt.u32.totalorder %s758_s16, %s893_s1 }
   0x4   :  { %p764_p2 = pnand %p762_p1, %p759_p0 }
   0x6   :  { %767 = shalt.err (!%p764_p2)
}
   0x7   :  { %s768_s21 = scalar_lea.vmem %s17_s13, 5120  ;;  %p773_p4 = scmp.lt.s32.totalorder %s17_s13, %s17_s13 }
   0x8   :  { %p769_p3 = scmp.ne.s32.totalorder %s17_s13, %s768_s21  ;;  %p774_p5 = scmp.lt.s32.totalorder %s768_s21, %s768_s21 }
   0xa   :  { %p775_p6 = por %p774_p5, %p773_p4 }
   0xc   :  { %p776_p7 = pnand %p775_p6, %p769_p3 }
   0xe   :  { %779 = shalt.err (!%p776_p7)
}
   0xf   :  { %s783_s22 = smov 64   ;;  %s784_s23 = smov 4  }
  0x10   :  { %22 = dma.hbm_to_vmem [thread:$0]  %s893_s1, 5120, %s17_s13, [#allocation3], %s783_s22, %s783_s22, %s784_s23  }
  0x11   :  { %780 = dma.done.wait [#allocation3], 5120  }
  0x12   :  { %781 = vsyncadd [#allocation3], 4294962176  ;;  %v785_v0 = vmov 0.0   ;;  %vm786_vm0 = vmmov 0   ;;  %v724_v1 = vld [vmem:[#allocation2] sm:$0xff]   ;;  %v725_v2 = vld [vmem:[#allocation2 + $0x8] sm:$0xff]   ;;  %v37_v20 = vlaneseq }
  0x13   :  { %631 = vmatprep.subr.bf16.mxu0 %v785_v0  ;;  %635 = vmatprep.mubr.msk.bf16.mxu0 %vm786_vm0, %v785_v0  ;;  %v30_v3 = vld [vmem:[%s892_s0] sm:$0xff]  ;;  %v31_v4 = vld [vmem:[%s892_s0 + $0x8] sm:$0xff]  ;;  %vm53_vm1 = vcmask 261120   ;;  %v728_v8 = vld [vmem:[#allocation2 + $0x50] sm:$0xff]  }
  0x14   :  { %639 = vmatprep.subr.bf16.mxu1 %v785_v0  ;;  %655 = vmatprep.mubr.msk.bf16.mxu1 %vm786_vm0, %v785_v0  ;;  %v726_v5 = vld [vmem:[#allocation2 + $0x40] sm:$0xff]   ;;  %v32_v6 = vpack.c.bf16 %v31_v4, %v30_v3  ;;  %v727_v7 = vld [vmem:[#allocation2 + $0x48] sm:$0xff]   ;;  %v729_v9 = vld [vmem:[#allocation2 + $0x58] sm:$0xff]   ;;  %v849_v21 = vshrl.u32 %v37_v20, 7 }
  0x15   :  { %632 = vmatpush3.bf16.msra.mxu0 %v724_v1  ;;  %640 = vmatpush3.bf16.msra.mxu1 %v726_v5  ;;  %v730_v10 = vld [vmem:[#allocation2 + $0x60] sm:$0xff]   ;;  %v731_v11 = vld [vmem:[#allocation2 + $0x68] sm:$0xff]   ;;  %v732_v12 = vld [vmem:[#allocation2 + $0x70] sm:$0xff]  }
  0x16   :  { %633 = vmatprep.subr.bf16.mxu0 %v785_v0  ;;  %641 = vmatprep.subr.bf16.mxu1 %v785_v0  ;;  %v733_v13 = vld [vmem:[#allocation2 + $0x78] sm:$0xff]   ;;  %v734_v14 = vld [vmem:[#allocation2 + $0x80] sm:$0xff]   ;;  %v735_v15 = vld [vmem:[#allocation2 + $0x88] sm:$0xff]   ;;  %v39_v22 = vsub.s32 0, %v849_v21  ;;  %v120_v42 = vsub.s32 1, %v849_v21  ;;  %v233_v61 = vsub.s32 2, %v849_v21 }
  0x17   :  { %v736_v16 = vld [vmem:[#allocation2 + $0x90] sm:$0xff]   ;;  %v737_v17 = vld [vmem:[#allocation2 + $0x98] sm:$0xff]   ;;  %v738_v18 = vld [vmem:[#allocation2 + $0xa0] sm:$0xff]  }
  0x18   :  { %v739_v19 = vld [vmem:[#allocation2 + $0xa8] sm:$0xff]   ;;  %v855_v23 = vld [vmem:[%s894_s2] sm:$0xff]  ;;  %v740_v34 = vld [vmem:[#allocation2 + $0xb0] sm:$0xff]  }
  0x19   :  { %634 = vmatpush3.bf16.msra.mxu0 %v725_v2  ;;  %642 = vmatpush3.bf16.msra.mxu1 %v727_v7  ;;  %v40_v24 = vrot.slane %v855_v23, %v39_v22  ;;  %v741_v35 = vld [vmem:[#allocation2 + $0xb8] sm:$0xff]   ;;  %v742_v36 = vld [vmem:[#allocation2 + $0xc0] sm:$0xff]   ;;  %v743_v37 = vld [vmem:[#allocation2 + $0xc8] sm:$0xff]   ;;  %v121_v43 = vrot.slane %v855_v23, %v120_v42  ;;  %v234_v62 = vrot.slane %v855_v23, %v233_v61 }
  0x1a   :  { %659 = vmatprep.subr.bf16.mxu0 %v785_v0  ;;  %643 = vmatprep.subr.bf16.mxu1 %v785_v0  ;;  %v744_v38 = vld [vmem:[#allocation2 + $0xd0] sm:$0xff]   ;;  %v745_v39 = vld [vmem:[#allocation2 + $0xd8] sm:$0xff]   ;;  %v746_v40 = vld [vmem:[#allocation2 + $0xe0] sm:$0xff]  }
  0x1b   :  { %v747_v41 = vld [vmem:[#allocation2 + $0xe8] sm:$0xff]   ;;  %v748_v53 = vld [vmem:[#allocation2 + $0xf0] sm:$0xff]   ;;  %v749_v54 = vld [vmem:[#allocation2 + $0xf8] sm:$0xff]  }
  0x1c   :  { %636 = vmatmul.mubr.msk.bf16.vlgmr.msra.gmra.mrb[0].mxu0 %vm53_vm1, %v32_v6  ;;  %v750_v55 = vld [vmem:[#allocation2 + $0x100] sm:$0xff]   ;;  %v751_v56 = vld [vmem:[#allocation2 + $0x108] sm:$0xff]   ;;  %v752_v57 = vld [vmem:[#allocation2 + $0x110] sm:$0xff]  }
  0x1d   :  { %675 = vmatprep.mubr.msk.bf16.mxu0 %vm786_vm0, %v785_v0  ;;  %644 = vmatpush3.bf16.msra.mxu1 %v728_v8  ;;  %v753_v58 = vld [vmem:[#allocation2 + $0x118] sm:$0xff]   ;;  %v754_v59 = vld [vmem:[#allocation2 + $0x120] sm:$0xff]   ;;  %v755_v60 = vld [vmem:[#allocation2 + $0x128] sm:$0xff]  }
  0x1e   :  { %645 = vmatprep.subr.bf16.mxu1 %v785_v0  ;;  %660 = vmatpush3.bf16.msra.mxu0 %v734_v14 }
  0x1f   :  { %661 = vmatprep.subr.bf16.mxu0 %v785_v0 }
  0x21   :  { %646 = vmatpush3.bf16.msra.mxu1 %v729_v9  ;;  %v756_v9 = vld [vmem:[#allocation2 + $0x130] sm:$0xff]  }
  0x22   :  { %647 = vmatprep.subr.bf16.mxu1 %v785_v0  ;;  %662 = vmatpush3.bf16.msra.mxu0 %v735_v15 }
  0x23   :  { %663 = vmatprep.subr.bf16.mxu0 %v785_v0 }
  0x25   :  { %648 = vmatpush3.bf16.msra.mxu1 %v730_v10  ;;  %v757_v10 = vld [vmem:[#allocation2 + $0x138] sm:$0xff]  }
  0x26   :  { %649 = vmatprep.subr.bf16.mxu1 %v785_v0  ;;  %664 = vmatpush3.bf16.msra.mxu0 %v736_v16 }
  0x27   :  { %665 = vmatprep.subr.bf16.mxu0 %v785_v0 }
  0x29   :  { %650 = vmatpush3.bf16.msra.mxu1 %v731_v11  ;;  %v346_v11 = vsub.s32 3, %v849_v21 }
  0x2a   :  { %651 = vmatprep.subr.bf16.mxu1 %v785_v0  ;;  %666 = vmatpush3.bf16.msra.mxu0 %v737_v17 }
  0x2b   :  { %667 = vmatprep.subr.bf16.mxu0 %v785_v0 }
  0x2d   :  { %652 = vmatpush3.bf16.msra.mxu1 %v732_v12  ;;  %v347_v12 = vrot.slane %v855_v23, %v346_v11 }
  0x2e   :  { %653 = vmatprep.subr.bf16.mxu1 %v785_v0  ;;  %668 = vmatpush3.bf16.msra.mxu0 %v738_v18 }
  0x2f   :  { %669 = vmatprep.subr.bf16.mxu0 %v785_v0 }
  0x31   :  { %654 = vmatpush3.bf16.msra.mxu1 %v733_v13 }
  0x32   :  { %679 = vmatprep.subr.bf16.mxu1 %v785_v0  ;;  %670 = vmatpush3.bf16.msra.mxu0 %v739_v19 }
  0x33   :  { %671 = vmatprep.subr.bf16.mxu0 %v785_v0 }
  0x36   :  { %672 = vmatpush3.bf16.msra.mxu0 %v740_v34 }
  0x37   :  { %673 = vmatprep.subr.bf16.mxu0 %v785_v0 }
  0x3a   :  { %674 = vmatpush3.bf16.msra.mxu0 %v741_v35 }
  0x3b   :  { %699 = vmatprep.subr.bf16.mxu0 %v785_v0 }
  0xef   :  { %v91_v25 = vpop.f32.mrb[0].mxu0 }
  0xf0   :  { %v92_v26 = vadd.f32 %v91_v25, %v40_v24  ;;  %v637_v27 = vpop.f32.mrb[1].mxu0 }
  0xf1   :  { %v94_v28 = vpop.f32.mrb[2].mxu0 }
  0xf2   :  { %v95_v29 = vadd.f32 %v94_v28, %v40_v24  ;;  %v638_v30 = vpop.f32.mrb[3].mxu0  ;;  %v98_v31 = vmax.f32 %v92_v26, 0.0  ;;  %v459_v24 = vsub.s32 4, %v849_v21 }
  0xf4   :  { %v99_v32 = vmax.f32 %v95_v29, 0.0 }
  0xf6   :  { %v100_v33 = vpack.c.bf16 %v99_v32, %v98_v31 }
  0xf8   :  { %656 = vmatmul.mubr.bf16.vlgmr.msra.gmra.mrb[0].mxu1 %v100_v33 }
  0xf9   :  { %695 = vmatprep.mubr.msk.bf16.mxu1 %vm786_vm0, %v785_v0  ;;  %680 = vmatpush3.bf16.msra.mxu1 %v742_v36 }
  0xfa   :  { %681 = vmatprep.subr.bf16.mxu1 %v785_v0 }
  0xfd   :  { %682 = vmatpush3.bf16.msra.mxu1 %v743_v37 }
  0xfe   :  { %683 = vmatprep.subr.bf16.mxu1 %v785_v0 }
 0x101   :  { %684 = vmatpush3.bf16.msra.mxu1 %v744_v38 }
 0x102   :  { %685 = vmatprep.subr.bf16.mxu1 %v785_v0 }
 0x105   :  { %686 = vmatpush3.bf16.msra.mxu1 %v745_v39 }
 0x106   :  { %687 = vmatprep.subr.bf16.mxu1 %v785_v0 }
 0x109   :  { %688 = vmatpush3.bf16.msra.mxu1 %v746_v40 }
 0x10a   :  { %689 = vmatprep.subr.bf16.mxu1 %v785_v0 }
 0x10d   :  { %690 = vmatpush3.bf16.msra.mxu1 %v747_v41 }
 0x10e   :  { %691 = vmatprep.subr.bf16.mxu1 %v785_v0 }
 0x111   :  { %692 = vmatpush3.bf16.msra.mxu1 %v748_v53 }
 0x112   :  { %693 = vmatprep.subr.bf16.mxu1 %v785_v0 }
 0x115   :  { %694 = vmatpush3.bf16.msra.mxu1 %v749_v54 }
 0x1cb   :  { %v204_v44 = vpop.f32.mrb[0].mxu1 }
 0x1cc   :  { %v205_v45 = vadd.f32 %v204_v44, %v121_v43  ;;  %v657_v46 = vpop.f32.mrb[1].mxu1 }
 0x1cd   :  { %v207_v47 = vpop.f32.mrb[2].mxu1 }
 0x1ce   :  { %v208_v48 = vadd.f32 %v207_v47, %v121_v43  ;;  %v658_v49 = vpop.f32.mrb[3].mxu1  ;;  %v211_v50 = vmax.f32 %v205_v45, 0.0 }
 0x1d0   :  { %v212_v51 = vmax.f32 %v208_v48, 0.0 }
 0x1d2   :  { %v213_v52 = vpack.c.bf16 %v212_v51, %v211_v50 }
 0x1d4   :  { %676 = vmatmul.mubr.bf16.vlgmr.msra.gmra.mrb[4].mxu0 %v213_v52 }
 0x1d5   :  { %715 = vmatprep.mubr.msk.bf16.mxu0 %vm786_vm0, %v785_v0  ;;  %700 = vmatpush3.bf16.msra.mxu0 %v750_v55 }
 0x1d6   :  { %701 = vmatprep.subr.bf16.mxu0 %v785_v0 }
 0x1d9   :  { %702 = vmatpush3.bf16.msra.mxu0 %v751_v56 }
 0x1da   :  { %703 = vmatprep.subr.bf16.mxu0 %v785_v0 }
 0x1dd   :  { %704 = vmatpush3.bf16.msra.mxu0 %v752_v57 }
 0x1de   :  { %705 = vmatprep.subr.bf16.mxu0 %v785_v0 }
 0x1e1   :  { %706 = vmatpush3.bf16.msra.mxu0 %v753_v58 }
 0x1e2   :  { %707 = vmatprep.subr.bf16.mxu0 %v785_v0 }
 0x1e5   :  { %708 = vmatpush3.bf16.msra.mxu0 %v754_v59 }
 0x1e6   :  { %709 = vmatprep.subr.bf16.mxu0 %v785_v0 }
 0x1e9   :  { %710 = vmatpush3.bf16.msra.mxu0 %v755_v60 }
 0x1ea   :  { %711 = vmatprep.subr.bf16.mxu0 %v785_v0 }
 0x1ed   :  { %712 = vmatpush3.bf16.msra.mxu0 %v756_v9 }
 0x1ee   :  { %713 = vmatprep.subr.bf16.mxu0 %v785_v0  ;;  %v460_v0 = vrot.slane %v855_v23, %v459_v24 }
 0x1f1   :  { %714 = vmatpush3.bf16.msra.mxu0 %v757_v10 }
 0x2a7   :  { %v317_v63 = vpop.f32.mrb[4].mxu0 }
 0x2a8   :  { %v318_v1 = vadd.f32 %v317_v63, %v234_v62  ;;  %v677_v2 = vpop.f32.mrb[5].mxu0 }
 0x2a9   :  { %v320_v3 = vpop.f32.mrb[6].mxu0 }
 0x2aa   :  { %v321_v4 = vadd.f32 %v320_v3, %v234_v62  ;;  %v678_v5 = vpop.f32.mrb[7].mxu0  ;;  %v324_v6 = vmax.f32 %v318_v1, 0.0 }
 0x2ac   :  { %v325_v7 = vmax.f32 %v321_v4, 0.0 }
 0x2ae   :  { %v326_v8 = vpack.c.bf16 %v325_v7, %v324_v6 }
 0x2b0   :  { %696 = vmatmul.mubr.bf16.vlgmr.msra.gmra.mrb[4].mxu1 %v326_v8 }
 0x383   :  { %v430_v13 = vpop.f32.mrb[4].mxu1 }
 0x384   :  { %v431_v14 = vadd.f32 %v430_v13, %v347_v12  ;;  %v697_v15 = vpop.f32.mrb[5].mxu1 }
 0x385   :  { %v433_v16 = vpop.f32.mrb[6].mxu1 }
 0x386   :  { %v434_v17 = vadd.f32 %v433_v16, %v347_v12  ;;  %v698_v18 = vpop.f32.mrb[7].mxu1  ;;  %v437_v19 = vmax.f32 %v431_v14, 0.0 }
 0x388   :  { %v438_v20 = vmax.f32 %v434_v17, 0.0 }
 0x38a   :  { %v439_v22 = vpack.c.bf16 %v438_v20, %v437_v19 }
 0x38c   :  { %716 = vmatmul.mubr.bf16.vlgmr.msra.gmra.mrb[8].mxu0 %v439_v22 }
 0x45f   :  { %v543_v25 = vpop.f32.mrb[8].mxu0 }
 0x460   :  { %v544_v26 = vadd.f32 %v543_v25, %v460_v0  ;;  %v717_v27 = vpop.f32.mrb[9].mxu0 }
 0x461   :  { %v546_v28 = vpop.f32.mrb[10].mxu0 }
 0x462   :  { %550 = vst [vmem:[%s895_s3] sm:$0xff] %v544_v26  ;;  %v547_v29 = vadd.f32 %v546_v28, %v460_v0  ;;  %v718_v30 = vpop.f32.mrb[11].mxu0 }
 0x464   :  { %551 = vst [vmem:[%s895_s3 + $0x8] sm:$0xff] %v547_v29 }
 0x465   :  { %556 = vsyncpa [#allocation3], 1 }

</bundles_post_ra>
